<compile_context>
chip_gen: v7x
topology: tpu7x:2x2x1
jax: 0.10.0
libtpu: 0.0.40
codegen_flags: <defaults>
</compile_context>

<pallas_src>
import functools

import jax
import jax.numpy as jnp
from jax.experimental import pallas as pl
from jax.experimental.pallas import tpu as pltpu


def _round_up(a, b):
    return ((a + b - 1) // b) * b


def _vmem_capacity_bytes():
    try:
        cap = getattr(pltpu.get_tpu_info(), "vmem_capacity_bytes", 0)
        if cap:
            return int(cap)
    except Exception:
        pass
    return 64 << 20  # conservative fallback (v7x per-TC VMEM)


def _convx_kernel(x_ref, w_ref, b_ref, o_ref, *, K, stride, TL):
    """One (Cout-tile, batch element, L-tile) grid step.

    x_ref: (1, 1, stride, Cin_p, TL+Q)  halo-prestacked, phase-deinterleaved tile
    w_ref: (CT, Cin_p*K)                BN-scale-folded weight, im2col packed
    b_ref: (CT, 1)                      BN shift (f32)
    o_ref: (1, CT, TL)                  output tile
    """
    # im2col LHS, rows ordered k-major / ci-minor (matches the weight packing).
    # Tap k reads stride-phase r = k % stride at per-phase column offset
    # q = k // stride; each tap is a static slice of the prestacked tile.
    cols = jnp.concatenate(
        [x_ref[0, 0, k % stride, :, (k // stride):(k // stride) + TL]
         for k in range(K)],
        axis=0)                                                       # (Cin_p*K, TL)
    acc = jnp.dot(w_ref[...], cols, preferred_element_type=jnp.float32)  # (CT, TL)
    o_ref[0] = jnp.maximum(acc + b_ref[...], 0.0).astype(o_ref.dtype)


def convx_forward(x, weight, gamma, beta, running_mean, running_var, *,
                  stride=1, padding=None, eps=1e-5,
                  compute_dtype=None, tile_l=512):
    """ConvX forward.  x: (N, Cin, L).  Returns (N, Cout, Lout) in x.dtype."""
    Cout, Cin, K = weight.shape
    N, Cin_x, L = x.shape
    assert Cin_x == Cin
    pad = K // 2 if padding is None else padding
    Lpad = L + 2 * pad
    Lout = (Lpad - K) // stride + 1
    assert Lout >= 1
    out_dtype = x.dtype
    cdt = jnp.dtype(out_dtype if compute_dtype is None else compute_dtype)
    itc = cdt.itemsize
    ito = jnp.dtype(out_dtype).itemsize
    sub = 8 * (4 // itc)                 # sublane tile: 8 f32, 16 bf16, 32 int8

    vmem_cap = _vmem_capacity_bytes()

    # ---- fold BN (eval mode) into the weight (scale) + per-channel shift ----
    scale = gamma.astype(jnp.float32) / jnp.sqrt(running_var.astype(jnp.float32) + eps)
    shift = beta.astype(jnp.float32) - running_mean.astype(jnp.float32) * scale

    # ---- channel padding so every block is tile-aligned ---------------------
    Cin_p = _round_up(Cin, sub)
    if Cout <= 128:
        CT = _round_up(Cout, sub)
        Cout_p = CT
    else:
        CT = 256 if (Cout % 256 == 0 and vmem_cap >= (100 << 20)) else 128
        Cout_p = _round_up(Cout, CT)
    n_ct = Cout_p // CT

    # ---- lane-dense output tiling -------------------------------------------
    tile_l = max(128, (int(tile_l) // 128) * 128)
    TL = min(tile_l, _round_up(Lout, 128))
    n_lt = pl.cdiv(Lout, TL)
    Lout_p = n_lt * TL

    # ---- im2col weight packing: column index = k * Cin_p + ci ---------------
    w_f32 = weight.astype(jnp.float32) * scale[:, None, None]        # (Cout,Cin,K)
    w_f32 = jnp.pad(w_f32, ((0, Cout_p - Cout), (0, Cin_p - Cin), (0, 0)))
    w2 = jnp.transpose(w_f32, (0, 2, 1)).reshape(Cout_p, K * Cin_p).astype(cdt)
    shift_p = jnp.pad(shift, (0, Cout_p - Cout)).reshape(Cout_p, 1)

    # ---- phase-deinterleaved, halo-prestacked input tiles (XLA glue) --------
    Q = (K - 1) // stride                # halo width in per-phase columns
    TLin = TL + Q
    Lph = Lout_p + Q                     # per-phase columns needed
    Lfull = Lph * stride                 # raw padded length to materialize
    right = Lfull - (L + pad)
    x_p = jnp.pad(x, ((0, 0), (0, Cin_p - Cin), (pad, max(right, 0))))[:, :, :Lfull]
    # x_ph[n, r, ci, m] == x_padded[n, ci, m*stride + r]
    x_ph = x_p.reshape(N, Cin_p, Lph, stride).transpose(0, 3, 1, 2)
    # each L-tile carries its own Q overlap columns (no separate halo stream)
    col_idx = jnp.arange(n_lt)[:, None] * TL + jnp.arange(TLin)[None, :]
    x_tiles = jnp.transpose(x_ph[:, :, :, col_idx], (0, 3, 1, 2, 4)).astype(cdt)
    # x_tiles: (N, n_lt, stride, Cin_p, TLin)

    kernel = functools.partial(_convx_kernel, K=K, stride=stride, TL=TL)

    # ---- grid order: keep the larger operand stationary ---------------------
    weight_bytes = Cout_p * K * Cin_p * itc
    body_bytes = N * n_lt * stride * Cin_p * TLin * itc
    co_outer = (n_ct - 1) * body_bytes <= (N * n_lt - 1) * weight_bytes

    x_block = (1, 1, stride, Cin_p, TLin)
    w_block = (CT, K * Cin_p)
    s_block = (CT, 1)
    o_block = (1, CT, TL)
    if co_outer:
        grid = (n_ct, N, n_lt)
        in_specs = [
            pl.BlockSpec(x_block, lambda co, n, j: (n, j, 0, 0, 0)),
            pl.BlockSpec(w_block, lambda co, n, j: (co, 0)),
            pl.BlockSpec(s_block, lambda co, n, j: (co, 0)),
        ]
        out_specs = pl.BlockSpec(o_block, lambda co, n, j: (n, co, j))
    else:
        grid = (N, n_lt, n_ct)
        in_specs = [
            pl.BlockSpec(x_block, lambda n, j, co: (n, j, 0, 0, 0)),
            pl.BlockSpec(w_block, lambda n, j, co: (co, 0)),
            pl.BlockSpec(s_block, lambda n, j, co: (co, 0)),
        ]
        out_specs = pl.BlockSpec(o_block, lambda n, j, co: (n, co, j))

    # ---- VMEM budget derived from the actual block sizes --------------------
    per_step_bytes = (2 * stride * Cin_p * TLin * itc        # body (double-buffered)
                      + 2 * CT * K * Cin_p * itc             # weight
                      + 2 * CT * 128 * 4                     # shift (lane-padded)
                      + 2 * CT * TL * ito                    # output
                      + K * Cin_p * TL * itc                 # im2col scratch
                      + 2 * CT * TL * 4)                     # f32 accumulator
    vmem_limit = int(min(0.75 * vmem_cap, max(32 << 20, 2 * per_step_bytes)))

    flops = 2 * N * Cout_p * Lout_p * Cin_p * K
    if co_outer:
        bytes_accessed = weight_bytes + n_ct * body_bytes
    else:
        bytes_accessed = body_bytes + N * n_lt * weight_bytes
    bytes_accessed += N * Cout_p * Lout_p * ito

    out_p = pl.pallas_call(
        kernel,
        out_shape=jax.ShapeDtypeStruct((N, Cout_p, Lout_p), out_dtype),
        grid=grid,
        in_specs=in_specs,
        out_specs=out_specs,
        compiler_params=pltpu.CompilerParams(
            dimension_semantics=("parallel", "parallel", "parallel"),
            vmem_limit_bytes=vmem_limit),
        cost_estimate=pl.CostEstimate(flops=flops, transcendentals=0,
                                      bytes_accessed=bytes_accessed),
    )(x_tiles, w2, shift_p)

    if Cout_p == Cout and Lout_p == Lout:
        return out_p
    return out_p[:, :Cout, :Lout]


def convx_reference(x, weight, gamma, beta, running_mean, running_var, *,
                    stride=1, padding=None, eps=1e-5):
    """Pure-JAX reference (PyTorch Conv1d + eval BatchNorm1d + ReLU)."""
    Cout, Cin, K = weight.shape
    pad = K // 2 if padding is None else padding
    y = jax.lax.conv_general_dilated(
        x, weight,
        window_strides=(stride,),
        padding=[(pad, pad)],
        dimension_numbers=("NCH", "OIH", "NCH"),
    )
    scale = (gamma / jnp.sqrt(running_var + eps)).reshape(1, Cout, 1)
    shift = (beta - running_mean * gamma / jnp.sqrt(running_var + eps)).reshape(1, Cout, 1)
    return jnp.maximum(y * scale + shift, 0.0)


def _make_inputs(key, N, Cin, Cout, L, K):
    kx, kw, kg, kb, km, kv = jax.random.split(key, 6)
    x = jax.random.normal(kx, (N, Cin, L), dtype=jnp.float32)
    weight = jax.random.normal(kw, (Cout, Cin, K), dtype=jnp.float32) * 0.1
    gamma = 1.0 + 0.1 * jax.random.normal(kg, (Cout,), dtype=jnp.float32)
    beta = 0.1 * jax.random.normal(kb, (Cout,), dtype=jnp.float32)
    running_mean = 0.1 * jax.random.normal(km, (Cout,), dtype=jnp.float32)
    running_var = jnp.abs(1.0 + 0.1 * jax.random.normal(kv, (Cout,), dtype=jnp.float32))
    return x, weight, gamma, beta, running_mean, running_var


if __name__ == "__main__":
    key1, key2 = jax.random.split(jax.random.PRNGKey(0))

    # --- case 1: module defaults (kernel=3, stride=1), small shapes, f32 -----
    N, Cin, Cout, L, K = 2, 4, 8, 16, 3
    args = _make_inputs(key1, N, Cin, Cout, L, K)
    out = jax.block_until_ready(convx_forward(*args))
    ref = convx_reference(*args)
    assert out.shape == (N, Cout, L), out.shape
    assert jnp.allclose(out, ref, atol=1e-5, rtol=1e-5), \
        float(jnp.max(jnp.abs(out - ref)))

    # --- case 2: same shapes, bf16 compute with f32 accumulation -------------
    # Note: BN scale is folded into the weight before the bf16 cast, so the
    # folded weight carries one extra bf16 quantization (within 3e-2 tol).
    out_bf16 = jax.block_until_ready(
        convx_forward(*args, compute_dtype=jnp.bfloat16))
    assert out_bf16.shape == (N, Cout, L), out_bf16.shape
    assert jnp.allclose(out_bf16, ref, atol=3e-2, rtol=3e-2), \
        float(jnp.max(jnp.abs(out_bf16 - ref)))

    # --- case 3: strided conv + L-axis tiling + halo path, f32 ---------------
    N2, Cin2, Cout2, L2, K2, stride2 = 2, 4, 8, 300, 5, 2
    args2 = _make_inputs(key2, N2, Cin2, Cout2, L2, K2)
    out2 = jax.block_until_ready(
        convx_forward(*args2, stride=stride2, tile_l=128))
    ref2 = convx_reference(*args2, stride=stride2)
    assert out2.shape == ref2.shape, (out2.shape, ref2.shape)
    assert jnp.allclose(out2, ref2, atol=1e-4, rtol=1e-4), \
        float(jnp.max(jnp.abs(out2 - ref2)))

    print("KERNEL_OK")
</pallas_src>

<mosaic_0001>
module attributes {stable_mosaic.version = 11 : i64} {
  func.func @_convx_kernel(%arg0: i32, %arg1: i32, %arg2: i32, %arg3: memref<1x1x1x8x130xf32, #tpu.memory_space<vmem>>, %arg4: memref<8x24xf32, #tpu.memory_space<vmem>>, %arg5: memref<8x1xf32, #tpu.memory_space<vmem>>, %arg6: memref<1x8x128xf32, #tpu.memory_space<vmem>>) attributes {dimension_semantics = [#tpu.dimension_semantics<parallel>, #tpu.dimension_semantics<parallel>, #tpu.dimension_semantics<parallel>], iteration_bounds = array<i64: 1, 2, 1>, scalar_prefetch = 0 : i64, scratch_operands = 0 : i64, tpu.core_type = #tpu.core_type<tc>, window_params = [{transform_indices = @transform_0, window_bounds = array<i64: 1, 1, 1, 8, 130>}, {transform_indices = @transform_1, window_bounds = array<i64: 8, 24>}, {transform_indices = @transform_2, window_bounds = array<i64: 8, 1>}, {transform_indices = @transform_3, window_bounds = array<i64: 1, 8, 128>}]} {
    %c0 = arith.constant 0 : index
    %c0_0 = arith.constant 0 : index
    %c0_1 = arith.constant 0 : index
    %c0_2 = arith.constant 0 : index
    %c0_3 = arith.constant 0 : index
    %0 = vector.load %arg3[%c0, %c0_0, %c0_1, %c0_2, %c0_3] : memref<1x1x1x8x130xf32, #tpu.memory_space<vmem>>, vector<1x1x1x8x128xf32>
    %1 = vector.shape_cast %0 : vector<1x1x1x8x128xf32> to vector<8x128xf32>
    %c0_4 = arith.constant 0 : index
    %c0_5 = arith.constant 0 : index
    %c0_6 = arith.constant 0 : index
    %c0_7 = arith.constant 0 : index
    %c1 = arith.constant 1 : index
    %2 = vector.load %arg3[%c0_4, %c0_5, %c0_6, %c0_7, %c1] : memref<1x1x1x8x130xf32, #tpu.memory_space<vmem>>, vector<1x1x1x8x128xf32>
    %3 = vector.shape_cast %2 : vector<1x1x1x8x128xf32> to vector<8x128xf32>
    %c0_8 = arith.constant 0 : index
    %c0_9 = arith.constant 0 : index
    %c0_10 = arith.constant 0 : index
    %c0_11 = arith.constant 0 : index
    %c2 = arith.constant 2 : index
    %4 = vector.load %arg3[%c0_8, %c0_9, %c0_10, %c0_11, %c2] : memref<1x1x1x8x130xf32, #tpu.memory_space<vmem>>, vector<1x1x1x8x128xf32>
    %5 = vector.shape_cast %4 : vector<1x1x1x8x128xf32> to vector<8x128xf32>
    %6 = tpu.concatenate %1, %3, %5 in 0 : vector<8x128xf32>, vector<8x128xf32>, vector<8x128xf32> -> vector<24x128xf32>
    %c0_12 = arith.constant 0 : index
    %c0_13 = arith.constant 0 : index
    %7 = vector.load %arg4[%c0_12, %c0_13] : memref<8x24xf32, #tpu.memory_space<vmem>>, vector<8x24xf32>
    %cst = arith.constant dense<0.000000e+00> : vector<8x128xf32>
    %8 = tpu.matmul %7, %6, %cst {dimension_numbers = #tpu.dot_dimension_numbers<[1], [0], [0], [1], [0, 0, 1, 1], [], []>} : vector<8x24xf32>, vector<24x128xf32>, vector<8x128xf32> -> vector<8x128xf32>
    %c0_14 = arith.constant 0 : index
    %c0_15 = arith.constant 0 : index
    %9 = vector.load %arg5[%c0_14, %c0_15] : memref<8x1xf32, #tpu.memory_space<vmem>>, vector<8x1xf32>
    %10 = vector.broadcast %9 : vector<8x1xf32> to vector<8x128xf32>
    %11 = arith.addf %8, %10 : vector<8x128xf32>
    %cst_16 = arith.constant 0.000000e+00 : f32
    %12 = vector.broadcast %cst_16 : f32 to vector<8x128xf32>
    %13 = arith.maximumf %11, %12 : vector<8x128xf32>
    %c0_17 = arith.constant 0 : index
    %c0_18 = arith.constant 0 : index
    %c0_19 = arith.constant 0 : index
    %14 = vector.load %arg6[%c0_17, %c0_18, %c0_19] : memref<1x8x128xf32, #tpu.memory_space<vmem>>, vector<1x8x128xf32>
    %15 = vector.shape_cast %14 : vector<1x8x128xf32> to vector<8x128xf32>
    %16 = vector.shape_cast %13 : vector<8x128xf32> to vector<1x8x128xf32>
    tpu.vector_store %arg6[%c0_17, %c0_18, %c0_19], %16 {strides = array<i32>} : memref<1x8x128xf32, #tpu.memory_space<vmem>>, vector<1x8x128xf32>,
    return
  }
  func.func @transform_0(%arg0: i32, %arg1: i32, %arg2: i32) -> (i32, i32, i32, i32, i32) {
    %c0_i32 = arith.constant 0 : i32
    %c0_i32_0 = arith.constant 0 : i32
    %c0_i32_1 = arith.constant 0 : i32
    %c0_i32_2 = arith.constant 0 : i32
    return %arg1, %arg2, %c0_i32, %c0_i32_0, %c0_i32_1 : i32, i32, i32, i32, i32
  }
  func.func @transform_1(%arg0: i32, %arg1: i32, %arg2: i32) -> (i32, i32) {
    %c0_i32 = arith.constant 0 : i32
    %c0_i32_0 = arith.constant 0 : i32
    return %arg0, %c0_i32 : i32, i32
  }
  func.func @transform_2(%arg0: i32, %arg1: i32, %arg2: i32) -> (i32, i32) {
    %c0_i32 = arith.constant 0 : i32
    %c0_i32_0 = arith.constant 0 : i32
    return %arg0, %c0_i32 : i32, i32
  }
  func.func @transform_3(%arg0: i32, %arg1: i32, %arg2: i32) -> (i32, i32, i32) {
    %c0_i32 = arith.constant 0 : i32
    return %arg1, %arg0, %arg2 : i32, i32, i32
  }
}

</mosaic_0001>

<bundles_post_ra>
// kernel: tpu_custom_call.1
= control target key start
LH: loop header
LB: loop body
LE: loop exit
PB: predicated region body
PF: predicated region fallthrough
CT: control target
= control target key end

     0   :  { %8 = vsyncpa [#allocation3], 0  ;;  %s911_s0 = inlined_call_operand.hbm [shape: f32[2,1,1,8,130], index: 0, kind: input, shape index: {}]   ;;  %s912_s1 = inlined_call_operand.vmem [shape: f32[8,24], index: 1, kind: input, shape index: {}]   ;;  %s913_s2 = inlined_call_operand.vmem [shape: f32[8,1], index: 2, kind: input, shape index: {}]   ;;  %s914_s3 = inlined_call_operand.hbm [shape: f32[2,8,128], index: 3, kind: output, shape index: {}]  }
   0x1   :  { %10 = vsyncpa [#allocation3 + $0x1], 0 }
   0x2   :  { %11 = vsyncpa [#allocation4], 0 }
   0x3   :  { %13 = vsyncpa [#allocation4 + $0x1], 0  ;;  %s732_s12 = smov 0   ;;  %s734_s13 = smov 0  }
   0x4   :  { %s736_s14 = smov 0   ;;  %s738_s15 = smov 0  }
   0x5   :  { %s740_s16 = smov 0   ;;  %s742_s17 = smov 0  }
   0x6 LB: > { %s481_s18 = sadd.s32 4294967295, %s702_s17   ;;  %s482_s19 = sadd.s32 4294967294, %s702_s17   ;;  %s702_s17 = sphi %s742_s17, %s19_s17   ;;  %s698_s16 = sphi %s740_s16, %s930_s16   ;;  %s694_s15 = sphi %s738_s15, %s929_s15   ;;  %s690_s14 = sphi %s736_s14, %s928_s14   ;;  %s686_s13 = sphi %s734_s13, %s927_s13   ;;  %s682_s12 = sphi %s732_s12, %s926_s12  }
   0x7   : > { %s34_s20 = sadd.s32 1, %s698_s16  ;;  %s47_s21 = sadd.s32 1, %s690_s14 }
   0x8   : > { %p36_p0 = scmp.ge.s32.totalorder %s34_s20, 2  ;;  %p54_p1 = scmp.ne.s32.totalorder %s690_s14, %s686_s13 }
   0x9   : > { %p55_p2 = scmp.eq.s32.totalorder %s702_s17, 0  ;;  %p60_p3 = scmp.ne.s32.totalorder %s686_s13, %s682_s12 }
   0xa   : > { %s932_s20 = smov (%p36_p0, %s34_s20), 0  ;;  %p61_p5 = scmp.eq.s32.totalorder %s481_s18, 0 }
   0xb   : > { %p773_p4 = por %p55_p2, %p54_p1  ;;  %s42_s23 = ssub.s32 %s698_s16, %s932_s20 }
   0xc   : > { %p140_p6 = scmp.eq.s32.totalorder %s481_s18, 1  ;;  %p45_p7 = scmp.eq.s32.totalorder %s42_s23, 0 }
   0xd   : > { %p779_p8 = por %p61_p5, %p60_p3  ;;  %p146_p10 = scmp.eq.s32.totalorder %s482_s19, 1 }
   0xe   : > { %p783_p9 = por %p140_p6, %p54_p1  ;;  %p527_p13 = scmp.lt.s32.totalorder %s702_s17, 2 }
   0xf   : > { %s788_s26 = scalar_select %p45_p7, %s690_s14, %s47_s21  }
  0x10   : > { %s918_s25 = scalar_select %p783_p9, 1, 0 }
  0x11   : > { %p790_p11 = por %p146_p10, %p60_p3  ;;  %s180_s28 = sand.u32 1, %s690_s14  }
  0x12   : > { %s487_s29 = sshll.u32 %s180_s28, 4  ;;  %s498_s30 = sshll.u32 %s698_s16, 8 }
  0x13   : > { %s919_s27 = scalar_select %p790_p11, 1, 0 }
  0x14   : > { %s801_s6 = scalar_lea.hbm %s911_s0, %s498_s30  ;;  %s184_s7 = scalar_lea.vmem [#allocation2], %s487_s29 }
  0x15   : > { %s194_s8 = sshll.u32 %s184_s7, 4  ;;  %p807_p0 = pnand %p527_p13, %p773_p4  ;;  %s803_s8 = int_to_ptr.vmem [resolvable:$true] %s194_s8 }
  0x16   : > { %s181_s10 = scalar_lea.sflag [#allocation3], %s180_s28  ;;  %s590_s11 = scalar_lea.hbm %s801_s6, 256 }
  0x17   : > { %p591_p3 = scmp.ne.s32.totalorder %s801_s6, %s590_s11  ;;  %p592_p5 = pneg %p807_p0 }
  0x18   : > { %s595_s21 = scalar_lea.hbm %s911_s0, 512  ;;  %p596_p4 = scmp.lt.u32.totalorder %s801_s6, %s911_s0 }
  0x19   : > { %p593_p6 = pnand %p592_p5, %p591_p3  ;;  %p597_p10 = scmp.lt.u32.totalorder %s595_s21, %s590_s11 }
  0x1a   : > { %p599_p12 = scmp.lt.u32.totalorder %s590_s11, %s801_s6 }
  0x1b   : > { %p594_p7 = pneg %p593_p6  ;;  %p598_p13 = por %p597_p10, %p596_p4 }
  0x1d   : > { %p600_p1 = por %p599_p12, %p598_p13 }
  0x1f   : > { %p601_p2 = pnand %p600_p1, %p594_p7 }
  0x21   : > { %604 = shalt.err (!%p601_p2)
}
  0x22   : > { %s605_s28 = scalar_lea.vmem %s803_s8, 256  ;;  %s704_s29 = smov [#allocation2]  }
  0x23   : > { %p606_p3 = scmp.ne.s32.totalorder %s803_s8, %s605_s28  ;;  %s610_s30 = sshll.u32 %s704_s29, 4  ;;  %s611_s30 = int_to_ptr.vmem [resolvable:$false] %s610_s30 }
  0x24   : > { %s612_s4 = scalar_lea.vmem %s611_s30, 512  ;;  %p613_p9 = scmp.lt.s32.totalorder %s803_s8, %s611_s30 }
  0x25   : > { %p608_p6 = pnand %p606_p3, %p592_p5  ;;  %p614_p4 = scmp.lt.s32.totalorder %s612_s4, %s605_s28 }
  0x27   : > { %p609_p11 = pneg %p608_p6  ;;  %p615_p10 = por %p614_p4, %p613_p9 }
  0x29   : > { %p616_p12 = pnand %p615_p10, %p609_p11 }
  0x2b   : > { %619 = shalt.err (!%p616_p12)
}
  0x2c   : > { %522 = dma.hbm_to_vmem [thread:$0]  (!%p807_p0), %s801_s6, 256, %s803_s8, %s181_s10  }
  0x2d   : > { %p921_p1 = scmp.lt.s32.totalorder %s702_s17, 3  ;;  %p922_p2 = scmp.ge.s32.totalorder %s702_s17, 1 }
  0x2f   : > { %p200_p5 = pnand %p922_p2, %p921_p1 }
  0x30   : > { %s843_s5 = sand.u32 (!%p200_p5), 1, %s686_s13  }
  0x31   : > { %203 = sbr.rel (%p200_p5) target bundleno = 415 (0x19f), region = 32  ;;  %s491_s7 = sshll.u32 (!%p200_p5), %s843_s5, 4 }
  0x32   : > { %s206_s11 = scalar_lea.sflag (!%p200_p5), [#allocation3], %s843_s5  ;;  %s209_s18 = scalar_lea.vmem (!%p200_p5), [#allocation2], %s491_s7 }
  0x38   : > { %673 = dma.done.wait (%p779_p8), %s206_s11, 256  }
  0x39   : > { %675 = vsyncadd (%p779_p8), %s206_s11, 4294967040  ;;  %v705_v0 = vmov 0.0|0.0   ;;  %vm706_vm0 = vmmov 0   ;;  %v707_v1 = vmov 0.0   ;;  %v248_v2 = vld [vmem:[%s209_s18] sm:$0xff]  ;;  %v249_v3 = vld [vmem:[%s209_s18 + $0x8] sm:$0xff] }
  0x3a   : > { %512 = vmatprep.subr.bf16.mxu0 %v705_v0  ;;  %509 = vmatprep.mubr.msk.f32.mxu0 %vm706_vm0, %v707_v1  ;;  %v583_v4 = vpack.i.bf16 %v249_v3, %v248_v2  ;;  %s708_s6 = smov 126   ;;  %v709_v5 = vmov 0   ;;  %v267_v6 = vld [vmem:[%s913_s2] sm:$0xff]  ;;  %s710_s10 = smov 127   ;;  %vm256_vm1 = vcmask 1039360   ;;  %vm263_vm2 = vcmask 1031168  }
  0x3b   : > { %261 = vrot.lane.b32.xlu1 %v249_v3, %s708_s6  ;;  %589 = vset.pattern.permute.xlu0 %v709_v5  ;;  %v266_v15 = vld [vmem:[%s912_s1] sm:$0xff]  ;;  %vm273_vm3 = vcmask 195584   ;;  %s492_s21 = sshll.u32 %s843_s5, 3  ;;  %s495_s22 = sshll.u32 %s694_s15, 7 }
  0x3c   : > { %588 = vset.pattern.permute.xlu1 %v709_v5  ;;  %584 = vrot.lane.b32.xlu0 %v583_v4, %s710_s10  ;;  %s239_s23 = scalar_lea.vmem [#allocation5], %s492_s21  ;;  %s862_s4 = scalar_lea.hbm %s914_s3, %s495_s22 }
  0x3d   : > { %s365_s28 = sshll.u32 %s239_s23, 4  ;;  %s350_s7 = scalar_lea.sflag [#allocation4], %s843_s5  ;;  %s864_s28 = int_to_ptr.vmem [resolvable:$true] %s365_s28 }
  0x3e   : > { %s620_s11 = scalar_lea.vmem %s864_s28, 128  ;;  %p923_p9 = scmp.ne.s32.totalorder %s918_s25, 0 }
  0x3f   : > { %270 = vperm.xlu1 %588, %v267_v6   ;;  %p621_p8 = scmp.ne.s32.totalorder %s864_s28, %s620_s11  ;;  %s711_s15 = smov [#allocation5]  }
  0x40   : > { %259 = vrot.lane.b32.xlu0 %v248_v2, %s708_s6  ;;  %s624_s18 = sshll.u32 %s711_s15, 4  ;;  %s625_s18 = int_to_ptr.vmem [resolvable:$false] %s624_s18 }
  0x41   : > { %p622_p11 = pnand %p621_p8, %p923_p9  ;;  %s626_s6 = scalar_lea.vmem %s625_s18, 256 }
  0x42   : > { %p627_p7 = scmp.lt.s32.totalorder %s864_s28, %s625_s18  ;;  %p628_p13 = scmp.lt.s32.totalorder %s626_s6, %s620_s11 }
  0x43   : > { %p623_p0 = pneg %p622_p11 }
  0x44   : > { %p629_p3 = por %p628_p13, %p627_p7 }
  0x46   : > { %p630_p6 = pnand %p629_p3, %p623_p0 }
  0xad   : > { %v262_v12 = vpop.permute.xlu1 %261 }
  0xae   : > { %v585_v7 = vpop.permute.xlu0 %584 }
  0xaf   : > { %v587_v8 = vunpack.i.h.bf16 %v585_v7  ;;  %v586_v9 = vunpack.i.l.bf16 %v585_v7 }
  0xb1   : > { %v257_v10 = vsel %vm256_vm1, %v586_v9, %v587_v8 }
  0xb2   : > { %v513_v11 = vpack.c.bf16 %v257_v10, %v248_v2  ;;  %v260_v13 = vpop.permute.xlu0 %259 }
  0xb3   : > { %v264_v14 = vsel %vm263_vm2, %v260_v13, %v262_v12 }
  0xb4   : > { %514 = vmatpush3.bf16.msra.mxu0 %v513_v11 }
  0xb5   : > { %507 = vmatprep.subr.mxu0 %v707_v1 }
  0xb8   : > { %508 = vmatpush3.msra.mxu0 %v264_v14 }
  0xb9   : > { %510 = vmatmul.mubr.msk.f32.vlgmr.msra.gmra.mrb[0].mxu0 %vm273_vm3, %v266_v15 }
  0xbe   : > { %v271_v16 = vpop.permute.xlu1 %270 }
 0x18c   : > { %v343_v17 = vpop.f32.mrb[0].mxu0 }
 0x18d   : > { %v344_v18 = vadd.f32 %v343_v17, %v271_v16  ;;  %v511_v19 = vpop.f32.mrb[1].mxu0 }
 0x18f   : > { %v347_v20 = vmax.f32 %v344_v18, 0.0 }
 0x191   : > { %348 = vst [vmem:[%s239_s23] sm:$0xff] %v347_v20 }
 0x192   : > { %633 = shalt.err (!%p630_p6)
}
 0x193   : > { %s634_s5 = scalar_lea.hbm %s862_s4, 128  ;;  %s638_s10 = scalar_lea.hbm %s914_s3, 256 }
 0x194   : > { %p635_p4 = scmp.ne.s32.totalorder %s862_s4, %s634_s5  ;;  %p639_p1 = scmp.lt.u32.totalorder %s862_s4, %s914_s3 }
 0x195   : > { %p640_p2 = scmp.lt.u32.totalorder %s638_s10, %s634_s5  ;;  %p642_p8 = scmp.lt.u32.totalorder %s634_s5, %s862_s4 }
 0x196   : > { %p636_p10 = pnand %p635_p4, %p923_p9 }
 0x197   : > { %p641_p5 = por %p640_p2, %p639_p1 }
 0x198   : > { %p637_p12 = pneg %p636_p10 }
 0x199   : > { %p643_p11 = por %p642_p8, %p641_p5 }
 0x19b   : > { %p644_p0 = pnand %p643_p11, %p637_p12 }
 0x19d   : > { %647 = shalt.err (!%p644_p0)
}
 0x19e   : > { %517 = dma.vmem_to_hbm [thread:$0]  (%p923_p9), %s864_s28, 128, %s862_s4, %s350_s7  }
 0x19f PF: > { %s377_s21 = sand.u32 1, %s682_s12   ;;  %p924_p7 = scmp.ne.s32.totalorder %s919_s27, 0 }
 0x1a0   : > { %p925_p13 = scmp.ge.s32.totalorder %s702_s17, 2  ;;  %s378_s22 = scalar_lea.sflag [#allocation4], %s377_s21 }
 0x1a2   : > { %p524_p3 = pnand %p925_p13, %p924_p7 }
 0x1a4   : > { %677 = dma.done.wait (!%p524_p3), %s378_s22, 128  }
 0x1a5   : > { %679 = vsyncadd (!%p524_p3), %s378_s22, 4294967168  ;;  %s19_s17 = sadd.s32 1, %s702_s17   ;;  %s926_s12 = smov %s686_s13 }
 0x1a6   : > { %p16_p6 = scmp.ge.s32.totalorder %s19_s17, 4   ;;  %s927_s13 = smov %s690_s14 }
 0x1a7   : > { %s928_s14 = smov %s788_s26  ;;  %s929_s15 = smov %s698_s16 }
 0x1a8   : > { %s930_s16 = smov %s932_s20  ;;  %18 = sbr.rel (!%p16_p6) target bundleno = 6 (0x6), region = 83 }
 0x1af   :  { %383 = vsyncpa [#allocation3], 1 }
 0x1b0   :  { %385 = vsyncpa [#allocation3 + $0x1], 1 }
 0x1b1   :  { %386 = vsyncpa [#allocation4], 1 }
 0x1b2   :  { %388 = vsyncpa [#allocation4 + $0x1], 1 }

</bundles_post_ra>
